<compile_context>
chip_gen: v7x
topology: tpu7x:2x2x1
jax: 0.10.0
libtpu: 0.0.40
codegen_flags: <defaults>
</compile_context>

<pallas_src>
import jax
import jax.numpy as jnp
from jax.experimental import pallas as pl
from jax.experimental.pallas import tpu as pltpu


# ----------------------------- kernels ------------------------------------


def _relu_kernel(x_ref, o_ref):
    # Pure VPU elementwise max on the whole VMEM tile.
    o_ref[...] = jnp.maximum(x_ref[...], 0).astype(o_ref.dtype)


def _relu_jvp_kernel(x_ref, t_ref, o_ref, to_ref):
    # Fused primal + tangent: out = relu(x), jvp_out = t * (x > 0).
    x = x_ref[...]
    o_ref[...] = jnp.maximum(x, 0).astype(o_ref.dtype)
    to_ref[...] = jnp.where(x > 0, t_ref[...], 0).astype(to_ref.dtype)


# --------------------------- layout planning -------------------------------

_SUBLANE = 8
_TARGET_BLOCK_ELEMS = 256 * 1024   # ~1 MiB f32 per array per pipeline buffer


def _round_up(a, b):
    return ((a + b - 1) // b) * b


def _plan(n_elems):
    """Pick (lanes, block_rows, grid, padded_rows) for a flat array.

    Prefers the layout with the least padding (pad-free when n is divisible
    by 8*128), tie-broken toward wider (more lane-dense) slabs.
    """
    best = None
    for lanes in (1024, 512, 256, 128):
        rows = _round_up(pl.cdiv(n_elems, lanes), _SUBLANE)
        max_br = max(_SUBLANE,
                     (_TARGET_BLOCK_ELEMS // lanes) // _SUBLANE * _SUBLANE)
        grid = pl.cdiv(rows, max_br)
        block_rows = _round_up(pl.cdiv(rows, grid), _SUBLANE)
        padded_rows = grid * block_rows
        pad = padded_rows * lanes - n_elems
        cand = (pad, -lanes, lanes, block_rows, grid, padded_rows)
        if best is None or cand < best:
            best = cand
    _, _, lanes, block_rows, grid, padded_rows = best
    return lanes, block_rows, grid, padded_rows


def _to_slab(x_flat, padded_rows, lanes):
    n = x_flat.shape[0]
    padded = padded_rows * lanes
    if padded != n:                      # only pay the pad pass when needed
        x_flat = jnp.pad(x_flat, (0, padded - n))
    return x_flat.reshape(padded_rows, lanes)


def _from_slab(slab, n, orig_shape):
    return slab.reshape(-1)[:n].reshape(orig_shape)


# ------------------------------ wrappers -----------------------------------


def pallas_relu(x):
    """jvp_relu.forward(x) == F.relu(x), as a Pallas TPU kernel."""
    orig_shape = x.shape
    n = x.size
    lanes, block_rows, grid, padded_rows = _plan(n)
    x2 = _to_slab(x.reshape(-1), padded_rows, lanes)

    spec = pl.BlockSpec((block_rows, lanes), lambda i: (i, 0))
    out2 = pl.pallas_call(
        _relu_kernel,
        out_shape=jax.ShapeDtypeStruct((padded_rows, lanes), x.dtype),
        grid=(grid,),
        in_specs=[spec],
        out_specs=spec,
        compiler_params=pltpu.CompilerParams(
            dimension_semantics=("parallel",)),
    )(x2)
    return _from_slab(out2, n, orig_shape)


def pallas_relu_jvp(x, tangent):
    """jvp_relu.jvp_forward(x, t) -> (relu(x), t * (x > 0)), fused kernel."""
    assert x.shape == tangent.shape
    orig_shape = x.shape
    n = x.size
    lanes, block_rows, grid, padded_rows = _plan(n)
    x2 = _to_slab(x.reshape(-1), padded_rows, lanes)
    t2 = _to_slab(tangent.reshape(-1), padded_rows, lanes)

    spec = pl.BlockSpec((block_rows, lanes), lambda i: (i, 0))
    out2, jvp2 = pl.pallas_call(
        _relu_jvp_kernel,
        out_shape=(
            jax.ShapeDtypeStruct((padded_rows, lanes), x.dtype),
            jax.ShapeDtypeStruct((padded_rows, lanes), tangent.dtype),
        ),
        grid=(grid,),
        in_specs=[spec, spec],
        out_specs=(spec, spec),
        compiler_params=pltpu.CompilerParams(
            dimension_semantics=("parallel",)),
    )(x2, t2)
    return _from_slab(out2, n, orig_shape), _from_slab(jvp2, n, orig_shape)


# ------------------------------- test --------------------------------------

if __name__ == "__main__":
    key = jax.random.PRNGKey(0)
    k1, k2, k3 = jax.random.split(key, 3)

    # Small shape consistent with an activation module: (batch, C, H, W).
    x = jax.random.normal(k1, (2, 4, 16, 16), dtype=jnp.float32)
    t = jax.random.normal(k2, (2, 4, 16, 16), dtype=jnp.float32)
    # A ragged shape to exercise the pad/slice path.
    x_ragged = jax.random.normal(k3, (5, 77), dtype=jnp.float32)

    # forward
    out = jax.block_until_ready(pallas_relu(x))
    ref = jnp.maximum(x, 0.0)
    assert out.shape == x.shape
    assert jnp.allclose(out, ref, atol=0.0, rtol=0.0)

    out_r = jax.block_until_ready(pallas_relu(x_ragged))
    assert out_r.shape == x_ragged.shape
    assert jnp.allclose(out_r, jnp.maximum(x_ragged, 0.0))

    # jvp_forward (closed-form ReLU JVP, fused in one kernel)
    out_j, jvp_j = pallas_relu_jvp(x, t)
    out_j = jax.block_until_ready(out_j)
    jvp_j = jax.block_until_ready(jvp_j)
    ref_out, ref_jvp = jax.jvp(lambda a: jnp.maximum(a, 0.0), (x,), (t,))
    assert jnp.allclose(out_j, ref_out, atol=1e-6, rtol=1e-6)
    assert jnp.allclose(jvp_j, ref_jvp, atol=1e-6, rtol=1e-6)

    print("KERNEL_OK")
</pallas_src>

<mosaic_0001>
module attributes {stable_mosaic.version = 11 : i64} {
  func.func @_relu_kernel(%arg0: i32, %arg1: memref<8x256xf32, #tpu.memory_space<vmem>>, %arg2: memref<8x256xf32, #tpu.memory_space<vmem>>) attributes {dimension_semantics = [#tpu.dimension_semantics<parallel>], iteration_bounds = array<i64: 1>, scalar_prefetch = 0 : i64, scratch_operands = 0 : i64, tpu.core_type = #tpu.core_type<tc>, window_params = [{transform_indices = @transform_0, window_bounds = array<i64: 8, 256>}, {transform_indices = @transform_1, window_bounds = array<i64: 8, 256>}]} {
    %c0 = arith.constant 0 : index
    %c0_0 = arith.constant 0 : index
    %0 = vector.load %arg1[%c0, %c0_0] : memref<8x256xf32, #tpu.memory_space<vmem>>, vector<8x256xf32>
    %cst = arith.constant 0.000000e+00 : f32
    %1 = vector.broadcast %cst : f32 to vector<8x256xf32>
    %2 = arith.maximumf %0, %1 : vector<8x256xf32>
    %c0_1 = arith.constant 0 : index
    %c0_2 = arith.constant 0 : index
    %3 = vector.load %arg2[%c0_1, %c0_2] : memref<8x256xf32, #tpu.memory_space<vmem>>, vector<8x256xf32>
    tpu.vector_store %arg2[%c0_1, %c0_2], %2 {strides = array<i32>} : memref<8x256xf32, #tpu.memory_space<vmem>>, vector<8x256xf32>,
    return
  }
  func.func @transform_0(%arg0: i32) -> (i32, i32) {
    %c0_i32 = arith.constant 0 : i32
    %c0_i32_0 = arith.constant 0 : i32
    return %arg0, %c0_i32 : i32, i32
  }
  func.func @transform_1(%arg0: i32) -> (i32, i32) {
    %c0_i32 = arith.constant 0 : i32
    %c0_i32_0 = arith.constant 0 : i32
    return %arg0, %c0_i32 : i32, i32
  }
}

</mosaic_0001>

<bundles_post_ra>
// kernel: tpu_custom_call.1
= control target key start
LH: loop header
LB: loop body
LE: loop exit
PB: predicated region body
PF: predicated region fallthrough
CT: control target
= control target key end

     0   :  { %6 = vsyncpa [#allocation3], 0  ;;  %s128_s0 = inlined_call_operand.hbm [shape: f32[8,256], index: 0, kind: input, shape index: {}]   ;;  %s129_s1 = inlined_call_operand.hbm [shape: f32[8,256], index: 1, kind: output, shape index: {}]  }
   0x1   :  { %7 = vsyncpa [#allocation4], 0  ;;  %s92_s6 = smov [#allocation2]   ;;  %s44_s10 = scalar_lea.hbm %s128_s0, 256 }
   0x2   :  { %s14_s7 = sshll.u32 %s92_s6, 4  ;;  %p45_p0 = scmp.ne.s32.totalorder %s128_s0, %s44_s10  ;;  %s15_s7 = int_to_ptr.vmem [resolvable:$true] %s14_s7 }
   0x3   :  { %p48_p1 = scmp.lt.u32.totalorder %s44_s10, %s128_s0 }
   0x5   :  { %p50_p2 = pnand %p48_p1, %p45_p0 }
   0x7   :  { %53 = shalt.err (!%p50_p2)
}
   0x8   :  { %s54_s15 = scalar_lea.vmem %s15_s7, 256  ;;  %p59_p4 = scmp.lt.s32.totalorder %s15_s7, %s15_s7 }
   0x9   :  { %p55_p3 = scmp.ne.s32.totalorder %s15_s7, %s54_s15  ;;  %p60_p5 = scmp.lt.s32.totalorder %s54_s15, %s54_s15 }
   0xb   :  { %p61_p6 = por %p60_p5, %p59_p4 }
   0xd   :  { %p62_p7 = pnand %p61_p6, %p55_p3 }
   0xf   :  { %65 = shalt.err (!%p62_p7)
}
  0x10   :  { %17 = dma.hbm_to_vmem [thread:$0]  %s128_s0, 256, %s15_s7, [#allocation3]  }
  0x11   :  { %88 = dma.done.wait [#allocation3], 256  }
  0x12   :  { %89 = vsyncadd [#allocation3], 4294967040  ;;  %s93_s18 = smov [#allocation5]   ;;  %v21_v0 = vld [vmem:[#allocation2] sm:$0xff]  ;;  %v22_v1 = vld [vmem:[#allocation2 + $0x8] sm:$0xff] }
  0x13   :  { %s33_s19 = sshll.u32 %s93_s18, 4  ;;  %v23_v2 = vmax.f32 %v21_v0, 0.0  ;;  %v24_v3 = vmax.f32 %v22_v1, 0.0  ;;  %s34_s19 = int_to_ptr.vmem [resolvable:$true] %s33_s19 }
  0x14   :  { %s66_s20 = scalar_lea.vmem %s34_s19, 256  ;;  %p71_p9 = scmp.lt.s32.totalorder %s34_s19, %s34_s19 }
  0x15   :  { %25 = vst [vmem:[#allocation5] sm:$0xff] %v23_v2  ;;  %26 = vst [vmem:[#allocation5 + $0x8] sm:$0xff] %v24_v3  ;;  %p67_p8 = scmp.ne.s32.totalorder %s34_s19, %s66_s20  ;;  %p72_p10 = scmp.lt.s32.totalorder %s66_s20, %s66_s20 }
  0x17   :  { %p73_p11 = por %p72_p10, %p71_p9 }
  0x19   :  { %p74_p12 = pnand %p73_p11, %p67_p8 }
  0x1b   :  { %77 = shalt.err (!%p74_p12)
}
  0x1c   :  { %s78_s22 = scalar_lea.hbm %s129_s1, 256 }
  0x1d   :  { %p79_p13 = scmp.ne.s32.totalorder %s129_s1, %s78_s22  ;;  %p82_p0 = scmp.lt.u32.totalorder %s78_s22, %s129_s1 }
  0x1f   :  { %p84_p1 = pnand %p82_p0, %p79_p13 }
  0x21   :  { %87 = shalt.err (!%p84_p1)
}
  0x22   :  { %36 = dma.vmem_to_hbm [thread:$0]  %s34_s19, 256, %s129_s1, [#allocation4]  }
  0x23   :  { %90 = dma.done.wait [#allocation4], 256  }
  0x24   :  { %91 = vsyncadd [#allocation4], 4294967040 }
  0x25   :  { %40 = vsyncpa [#allocation3], 1 }
  0x26   :  { %41 = vsyncpa [#allocation4], 1 }

</bundles_post_ra>
